<compile_context>
chip_gen: v6e
topology: v6e:2x2x1
jax: 0.10.0
libtpu: 0.0.40
codegen_flags: <defaults>
</compile_context>

<pallas_src>
import functools
import math

import jax
import jax.numpy as jnp
from jax.experimental import pallas as pl
from jax.experimental.pallas import tpu as pltpu


def _rgcn_kernel_self(a_ref, hw_ref, h_ref, wself_ref, b_ref, o_ref, acc_ref,
                      *, apply_relu):
    r = pl.program_id(1)

    @pl.when(r == 0)
    def _():
        # Fold self-loop + bias into the accumulator init so the matmul is
        # hidden behind the first A_r tile DMA instead of serializing at the end.
        acc_ref[...] = (
            jnp.dot(h_ref[...], wself_ref[...],
                    preferred_element_type=jnp.float32)
            + b_ref[...].astype(jnp.float32))

    # Message passing for relation r on this row block: A_r[tile] @ (H W_r).
    acc_ref[...] += jnp.dot(a_ref[...], hw_ref[...],
                            preferred_element_type=jnp.float32)

    @pl.when(r == pl.num_programs(1) - 1)
    def _():
        out = acc_ref[...]
        if apply_relu:
            out = jnp.maximum(out, 0.0)
        o_ref[...] = out.astype(o_ref.dtype)


def _rgcn_kernel_noself(a_ref, hw_ref, b_ref, o_ref, acc_ref, *, apply_relu):
    r = pl.program_id(1)

    @pl.when(r == 0)
    def _():
        acc_ref[...] = jnp.broadcast_to(b_ref[...].astype(jnp.float32),
                                        acc_ref.shape)

    acc_ref[...] += jnp.dot(a_ref[...], hw_ref[...],
                            preferred_element_type=jnp.float32)

    @pl.when(r == pl.num_programs(1) - 1)
    def _():
        out = acc_ref[...]
        if apply_relu:
            out = jnp.maximum(out, 0.0)
        o_ref[...] = out.astype(o_ref.dtype)


def rgcn_layer(adj, h, w_rel, w_self, bias, *, apply_relu=True,
               use_self_loop=True, tm=None):
    """One RelGraphConv-style layer:  ReLU( sum_r A_r H W_r + H W_self + b )."""
    R, N, _ = adj.shape
    Din = h.shape[1]
    Dout = w_rel.shape[2]

    # Plain-JAX glue: lane-dense per-relation slab HW_r = H @ W_r, one batched
    # matmul per layer; the kernel then only streams A against it.
    hw = jnp.einsum('nd,rdo->rno', h.astype(jnp.float32),
                    w_rel.astype(jnp.float32)).astype(jnp.bfloat16)
    adj_b = adj.astype(jnp.bfloat16)      # bandwidth-dominant input -> bf16
    bias_f = jnp.reshape(bias, (1, Dout)).astype(jnp.float32)

    # Row-block tile: biggest convenient tile; TM*N*2 B per A buffer stays far
    # under the scoped-VMEM limit on v5e/v6e/v7x for realistic N.
    if tm is None:
        tm = 256 if (N > 256 and N % 256 == 0) else N
    if N % tm != 0:
        tm = N
    grid = (N // tm, R)

    a_spec = pl.BlockSpec((pl.Squeezed(), tm, N), lambda i, r: (r, i, 0))
    hw_spec = pl.BlockSpec((pl.Squeezed(), N, Dout), lambda i, r: (r, 0, 0))
    bias_spec = pl.BlockSpec((1, Dout), lambda i, r: (0, 0))
    out_spec = pl.BlockSpec((tm, Dout), lambda i, r: (i, 0))

    if use_self_loop:
        kernel = functools.partial(_rgcn_kernel_self, apply_relu=apply_relu)
        in_specs = [
            a_spec,
            hw_spec,
            pl.BlockSpec((tm, Din), lambda i, r: (i, 0)),     # H row block
            pl.BlockSpec((Din, Dout), lambda i, r: (0, 0)),   # W_self resident
            bias_spec,
        ]
        args = (adj_b, hw, h.astype(jnp.bfloat16),
                w_self.astype(jnp.bfloat16), bias_f)
    else:
        kernel = functools.partial(_rgcn_kernel_noself, apply_relu=apply_relu)
        in_specs = [a_spec, hw_spec, bias_spec]
        args = (adj_b, hw, bias_f)

    return pl.pallas_call(
        kernel,
        out_shape=jax.ShapeDtypeStruct((N, Dout), h.dtype),
        grid_spec=pltpu.PrefetchScalarGridSpec(
            num_scalar_prefetch=0,
            grid=grid,
            in_specs=in_specs,
            out_specs=out_spec,
            scratch_shapes=[pltpu.VMEM((tm, Dout), jnp.float32)],
        ),
        compiler_params=pltpu.CompilerParams(
            # Row blocks are independent -> "parallel" (megacore on v7x);
            # relation axis reduces into the resident accumulator -> "arbitrary"
            # and placed last.
            dimension_semantics=("parallel", "arbitrary"),
            vmem_limit_bytes=48 * 1024 * 1024),
    )(*args)


class BaseRGCNPallas:
    """JAX/Pallas mirror of BaseRGCN.

    build_input_layer / build_output_layer return None in the base class, so the
    model is a stack of `num_hidden_layers` R-GCN hidden layers (h_dim -> h_dim)
    with basis decomposition, optional self-loop, and ReLU — the standard
    RelGraphConv concretization of the abstract build_hidden_layer.
    """

    def __init__(self, key, num_nodes, h_dim, out_dim, num_rels, num_bases,
                 num_hidden_layers=1, dropout=0.0, use_self_loop=False):
        self.num_nodes = num_nodes
        self.h_dim = h_dim
        self.out_dim = out_dim
        self.num_rels = num_rels
        self.num_bases = num_rels if num_bases < 0 else num_bases
        self.num_hidden_layers = num_hidden_layers
        self.dropout = dropout  # TODO(synk): dropout==0 -> identity; stochastic dropout not emitted
        self.use_self_loop = use_self_loop

        # TODO(synk): build_hidden_layer is abstract in BaseRGCN; this uses the
        # canonical RelGraphConv(basis) instantiation.
        self.layers = []
        for _ in range(num_hidden_layers):
            key, kb, kc, ks, kbias = jax.random.split(key, 5)
            bases = jax.random.normal(kb, (self.num_bases, h_dim, h_dim),
                                      jnp.float32) * (1.0 / math.sqrt(h_dim))
            coeff = jax.random.normal(kc, (num_rels, self.num_bases),
                                      jnp.float32) * (1.0 / math.sqrt(self.num_bases))
            # basis decomposition: W_r = sum_b coeff[r, b] * bases[b]
            w_rel = jnp.einsum('rb,bio->rio', coeff, bases)
            if use_self_loop:
                w_self = jax.random.normal(ks, (h_dim, h_dim),
                                           jnp.float32) * (1.0 / math.sqrt(h_dim))
            else:
                w_self = jnp.zeros((h_dim, h_dim), jnp.float32)
            bias = jax.random.normal(kbias, (1, h_dim), jnp.float32) * 0.01
            self.layers.append((w_rel, w_self, bias, True))  # hidden layers use ReLU

    def forward(self, adj, h):
        for (w_rel, w_self, bias, relu) in self.layers:
            h = rgcn_layer(adj, h, w_rel, w_self, bias,
                           apply_relu=relu, use_self_loop=self.use_self_loop)
        return h


if __name__ == "__main__":
    key = jax.random.PRNGKey(0)
    # nodes, h_dim (lane-dense 128), num_rels, num_bases, edges
    N, H, R, B, E = 128, 128, 4, 2, 512

    k1, k2, k3, k4, k5 = jax.random.split(key, 5)
    h = jax.random.normal(k1, (N, H), jnp.float32)
    src = jax.random.randint(k2, (E,), 0, N)
    dst = jax.random.randint(k3, (E,), 0, N)
    rel = jax.random.randint(k4, (E,), 0, R)

    # per-destination normalization (1 / in-degree), as in standard R-GCN `norm`
    in_deg = jnp.zeros((N,), jnp.float32).at[dst].add(1.0)
    norm = 1.0 / jnp.maximum(in_deg[dst], 1.0)

    # glue: sparse edge list -> dense per-relation adjacency with norm baked in
    # TODO(synk): at real graph scale, skip all-zero adjacency tiles via scalar
    # prefetch / CSR-block gather instead of streaming a dense (R, N, N) tensor.
    adj = jnp.zeros((R, N, N), jnp.float32).at[rel, dst, src].add(norm)

    model = BaseRGCNPallas(
        k5, num_nodes=N, h_dim=H, out_dim=H, num_rels=R, num_bases=B,
        num_hidden_layers=1, dropout=0.0, use_self_loop=True)

    out = model.forward(adj, h)
    jax.block_until_ready(out)

    # pure-JAX reference applying the same bf16 casts the kernel sees
    w_rel, w_self, bias, _ = model.layers[0]
    hw_ref = jnp.einsum('nd,rdo->rno', h.astype(jnp.float32),
                        w_rel.astype(jnp.float32)).astype(jnp.bfloat16)
    ref = jnp.einsum('rvn,rno->vo',
                     adj.astype(jnp.bfloat16).astype(jnp.float32),
                     hw_ref.astype(jnp.float32),
                     precision=jax.lax.Precision.HIGHEST)
    ref = ref + jnp.dot(h.astype(jnp.bfloat16).astype(jnp.float32),
                        w_self.astype(jnp.bfloat16).astype(jnp.float32),
                        precision=jax.lax.Precision.HIGHEST)
    ref = jnp.maximum(ref + bias, 0.0)
    assert jnp.allclose(out, ref, atol=1e-2, rtol=1e-2), (
        float(jnp.max(jnp.abs(out - ref))))

    print("KERNEL_OK")
</pallas_src>

<mosaic_0001>
module attributes {stable_mosaic.version = 11 : i64} {
  func.func @_rgcn_kernel_self(%arg0: i32, %arg1: i32, %arg2: memref<1x128x128xbf16, #tpu.memory_space<vmem>>, %arg3: memref<1x128x128xbf16, #tpu.memory_space<vmem>>, %arg4: memref<128x128xbf16, #tpu.memory_space<vmem>>, %arg5: memref<128x128xbf16, #tpu.memory_space<vmem>>, %arg6: memref<1x128xf32, #tpu.memory_space<vmem>>, %arg7: memref<128x128xf32, #tpu.memory_space<vmem>>, %arg8: memref<128x128xf32, #tpu.memory_space<vmem>>) attributes {dimension_semantics = [#tpu.dimension_semantics<parallel>, #tpu.dimension_semantics<arbitrary>], iteration_bounds = array<i64: 1, 4>, scalar_prefetch = 0 : i64, scratch_operands = 1 : i64, tpu.core_type = #tpu.core_type<tc>, window_params = [{transform_indices = @transform_0, window_bounds = array<i64: 1, 128, 128>}, {transform_indices = @transform_1, window_bounds = array<i64: 1, 128, 128>}, {transform_indices = @transform_2, window_bounds = array<i64: 128, 128>}, {pipeline_mode = #tpu.pipeline_mode<synchronous>, transform_indices = @transform_3, window_bounds = array<i64: 128, 128>}, {pipeline_mode = #tpu.pipeline_mode<synchronous>, transform_indices = @transform_4, window_bounds = array<i64: 1, 128>}, {transform_indices = @transform_5, window_bounds = array<i64: 128, 128>}]} {
    %c0_i32 = arith.constant 0 : i32
    %0 = arith.cmpi eq, %arg1, %c0_i32 : i32
    %1 = arith.extui %0 : i1 to i32
    %c0_i32_0 = arith.constant 0 : i32
    %2 = arith.cmpi ne, %1, %c0_i32_0 : i32
    scf.if %2 {
      %c0_11 = arith.constant 0 : index
      %c0_12 = arith.constant 0 : index
      %14 = vector.load %arg4[%c0_11, %c0_12] : memref<128x128xbf16, #tpu.memory_space<vmem>>, vector<128x128xbf16>
      %c0_13 = arith.constant 0 : index
      %c0_14 = arith.constant 0 : index
      %15 = vector.load %arg5[%c0_13, %c0_14] : memref<128x128xbf16, #tpu.memory_space<vmem>>, vector<128x128xbf16>
      %cst_15 = arith.constant dense<0.000000e+00> : vector<128x128xf32>
      %16 = tpu.matmul %14, %15, %cst_15 {dimension_numbers = #tpu.dot_dimension_numbers<[1], [0], [0], [1], [0, 0, 1, 1], [], []>} : vector<128x128xbf16>, vector<128x128xbf16>, vector<128x128xf32> -> vector<128x128xf32>
      %c0_16 = arith.constant 0 : index
      %c0_17 = arith.constant 0 : index
      %17 = vector.load %arg6[%c0_16, %c0_17] : memref<1x128xf32, #tpu.memory_space<vmem>>, vector<1x128xf32>
      %18 = vector.broadcast %17 : vector<1x128xf32> to vector<128x128xf32>
      %19 = arith.addf %16, %18 : vector<128x128xf32>
      %c0_18 = arith.constant 0 : index
      %c0_19 = arith.constant 0 : index
      %20 = vector.load %arg8[%c0_18, %c0_19] : memref<128x128xf32, #tpu.memory_space<vmem>>, vector<128x128xf32>
      tpu.vector_store %arg8[%c0_18, %c0_19], %19 {strides = array<i32>} : memref<128x128xf32, #tpu.memory_space<vmem>>, vector<128x128xf32>,
    } else {
    }
    %c0 = arith.constant 0 : index
    %c0_1 = arith.constant 0 : index
    %3 = vector.load %arg8[%c0, %c0_1] : memref<128x128xf32, #tpu.memory_space<vmem>>, vector<128x128xf32>
    %c0_2 = arith.constant 0 : index
    %c0_3 = arith.constant 0 : index
    %c0_4 = arith.constant 0 : index
    %4 = vector.load %arg2[%c0_2, %c0_3, %c0_4] : memref<1x128x128xbf16, #tpu.memory_space<vmem>>, vector<1x128x128xbf16>
    %5 = vector.shape_cast %4 : vector<1x128x128xbf16> to vector<128x128xbf16>
    %c0_5 = arith.constant 0 : index
    %c0_6 = arith.constant 0 : index
    %c0_7 = arith.constant 0 : index
    %6 = vector.load %arg3[%c0_5, %c0_6, %c0_7] : memref<1x128x128xbf16, #tpu.memory_space<vmem>>, vector<1x128x128xbf16>
    %7 = vector.shape_cast %6 : vector<1x128x128xbf16> to vector<128x128xbf16>
    %cst = arith.constant dense<0.000000e+00> : vector<128x128xf32>
    %8 = tpu.matmul %5, %7, %cst {dimension_numbers = #tpu.dot_dimension_numbers<[1], [0], [0], [1], [0, 0, 1, 1], [], []>} : vector<128x128xbf16>, vector<128x128xbf16>, vector<128x128xf32> -> vector<128x128xf32>
    %9 = arith.addf %3, %8 : vector<128x128xf32>
    %c0_8 = arith.constant 0 : index
    %c0_9 = arith.constant 0 : index
    %10 = vector.load %arg8[%c0_8, %c0_9] : memref<128x128xf32, #tpu.memory_space<vmem>>, vector<128x128xf32>
    tpu.vector_store %arg8[%c0_8, %c0_9], %9 {strides = array<i32>} : memref<128x128xf32, #tpu.memory_space<vmem>>, vector<128x128xf32>,
    %c3_i32 = arith.constant 3 : i32
    %11 = arith.cmpi eq, %arg1, %c3_i32 : i32
    %12 = arith.extui %11 : i1 to i32
    %c0_i32_10 = arith.constant 0 : i32
    %13 = arith.cmpi ne, %12, %c0_i32_10 : i32
    scf.if %13 {
      %c0_11 = arith.constant 0 : index
      %c0_12 = arith.constant 0 : index
      %14 = vector.load %arg8[%c0_11, %c0_12] : memref<128x128xf32, #tpu.memory_space<vmem>>, vector<128x128xf32>
      %cst_13 = arith.constant 0.000000e+00 : f32
      %15 = vector.broadcast %cst_13 : f32 to vector<128x128xf32>
      %16 = arith.maximumf %14, %15 : vector<128x128xf32>
      %c0_14 = arith.constant 0 : index
      %c0_15 = arith.constant 0 : index
      %17 = vector.load %arg7[%c0_14, %c0_15] : memref<128x128xf32, #tpu.memory_space<vmem>>, vector<128x128xf32>
      tpu.vector_store %arg7[%c0_14, %c0_15], %16 {strides = array<i32>} : memref<128x128xf32, #tpu.memory_space<vmem>>, vector<128x128xf32>,
    } else {
    }
    return
  }
  func.func @transform_0(%arg0: i32, %arg1: i32) -> (i32, i32, i32) {
    %c0_i32 = arith.constant 0 : i32
    %c0_i32_0 = arith.constant 0 : i32
    return %arg1, %arg0, %c0_i32 : i32, i32, i32
  }
  func.func @transform_1(%arg0: i32, %arg1: i32) -> (i32, i32, i32) {
    %c0_i32 = arith.constant 0 : i32
    %c0_i32_0 = arith.constant 0 : i32
    %c0_i32_1 = arith.constant 0 : i32
    return %arg1, %c0_i32, %c0_i32_0 : i32, i32, i32
  }
  func.func @transform_2(%arg0: i32, %arg1: i32) -> (i32, i32) {
    %c0_i32 = arith.constant 0 : i32
    %c0_i32_0 = arith.constant 0 : i32
    return %arg0, %c0_i32 : i32, i32
  }
  func.func @transform_3(%arg0: i32, %arg1: i32) -> (i32, i32) {
    %c0_i32 = arith.constant 0 : i32
    %c0_i32_0 = arith.constant 0 : i32
    %c0_i32_1 = arith.constant 0 : i32
    return %c0_i32, %c0_i32_0 : i32, i32
  }
  func.func @transform_4(%arg0: i32, %arg1: i32) -> (i32, i32) {
    %c0_i32 = arith.constant 0 : i32
    %c0_i32_0 = arith.constant 0 : i32
    %c0_i32_1 = arith.constant 0 : i32
    return %c0_i32, %c0_i32_0 : i32, i32
  }
  func.func @transform_5(%arg0: i32, %arg1: i32) -> (i32, i32) {
    %c0_i32 = arith.constant 0 : i32
    %c0_i32_0 = arith.constant 0 : i32
    return %arg0, %c0_i32 : i32, i32
  }
}

</mosaic_0001>

<bundles_post_ra>
// kernel: tpu_custom_call.1
= control target key start
LH: loop header
LB: loop body
LE: loop exit
PB: predicated region body
PF: predicated region fallthrough
CT: control target
= control target key end

     0   :  { %s1779_s0 = inlined_call_operand.hbm [shape: bf16[4,128,128], index: 0, kind: input, shape index: {}]   ;;  %s1780_s1 = inlined_call_operand.hbm [shape: bf16[4,128,128], index: 1, kind: input, shape index: {}]   ;;  %s1781_s2 = inlined_call_operand.hbm [shape: bf16[128,128], index: 2, kind: input, shape index: {}]   ;;  %s1782_s3 = inlined_call_operand.hbm [shape: bf16[128,128], index: 3, kind: input, shape index: {}]   ;;  %s1783_s4 = inlined_call_operand.vmem [shape: f32[1,128], index: 4, kind: input, shape index: {}]   ;;  %s1784_s5 = inlined_call_operand.hbm [shape: f32[128,128], index: 5, kind: output, shape index: {}]  }
   0x1   :  { %1789 = sst [smem:[#allocation17_spill]] %s1779_s0 }
   0x2   :  { %10 = vsyncpa [#allocation4], 0 }
   0x3   :  { %12 = vsyncpa [#allocation4 + $0x1], 0 }
   0x4   :  { %13 = vsyncpa [#allocation7], 0 }
   0x5   :  { %15 = vsyncpa [#allocation7 + $0x1], 0 }
   0x6   :  { %16 = vsyncpa [#allocation10], 0 }
   0x7   :  { %17 = vsyncpa [#allocation5], 0  ;;  %s1578_s18 = smov 0   ;;  %s1580_s19 = smov 0  }
   0x8   :  { %s1582_s20 = smov 0   ;;  %s1584_s21 = smov 0  }
   0x9   :  { %s1586_s22 = smov 0   ;;  %s1588_s23 = smov 0  }
   0xa LB: > { %s1607_s24 = sadd.s32 4294967295, %s1537_s23   ;;  %p57_p0 = scmp.ne.s32.totalorder %s1521_s19, %s1517_s18  ;;  %s1537_s23 = sphi %s1588_s23, %s23_s23   ;;  %s1533_s22 = sphi %s1586_s22, %s1801_s22   ;;  %s1529_s21 = sphi %s1584_s21, %s1800_s21   ;;  %s1525_s20 = sphi %s1582_s20, %s1799_s20   ;;  %s1521_s19 = sphi %s1580_s19, %s1798_s19   ;;  %s1517_s18 = sphi %s1578_s18, %s1797_s18  }
   0xb   : > { %p58_p1 = scmp.eq.s32.totalorder %s1607_s24, 0  ;;  %p1031_p2 = scmp.ge.s32.totalorder %s1537_s23, 1 }
   0xc   : > { %p188_p3 = scmp.lt.s32.totalorder %s1537_s23, 5  ;;  %s1539_s27 = smov [#allocation8]  }
   0xd   : > { %p1615_p4 = por %p58_p1, %p57_p0  ;;  %s203_s28 = sshll.u32 %s1539_s27, 4  ;;  %s204_s28 = int_to_ptr.vmem [resolvable:$true] %s203_s28 }
   0xe   : > { %p1619_p5 = pnand %p1031_p2, %p188_p3  ;;  %s1540_s30 = smov [#allocation9]  }
   0xf   : > { %s216_s6 = sshll.u32 %s1540_s30, 4  ;;  %s1350_s7 = scalar_lea.vmem %s204_s28, 1024  ;;  %s217_s6 = int_to_ptr.vmem [resolvable:$true] %s216_s6 }
  0x10   : > { %p1231_p6 = pneg %p1619_p5  ;;  %p1351_p9 = scmp.ne.s32.totalorder %s204_s28, %s1350_s7 }
  0x11   : > { %p1358_p12 = scmp.lt.s32.totalorder %s204_s28, %s204_s28  ;;  %p1359_p13 = scmp.lt.s32.totalorder %s1350_s7, %s1350_s7 }
  0x12   : > { %p1627_p7 = pnand %p1231_p6, %p58_p1 }
  0x13   : > { %p1360_p0 = por %p1359_p13, %p1358_p12 }
  0x14   : > { %p1341_p8 = pneg %p1627_p7 }
  0x16   : > { %p1353_p10 = pnand %p1351_p9, %p1341_p8 }
  0x18   : > { %p1354_p11 = pneg %p1353_p10 }
  0x1a   : > { %p1361_p2 = pnand %p1360_p0, %p1354_p11 }
  0x1c   : > { %1364 = shalt.err (!%p1361_p2)
}
  0x1d   : > { %s1785_s8 = smov 64   ;;  %s1787_s9 = smov 4  }
  0x1e   : > { %1234 = dma.hbm_to_vmem [thread:$0]  (!%p1627_p7), %s1781_s2, 1024, %s204_s28, [#allocation7], %s1785_s8, %s1785_s8, %s1787_s9  }
  0x1f   : > { %s1376_s12 = scalar_lea.vmem %s217_s6, 1024  ;;  %p1384_p10 = scmp.lt.s32.totalorder %s217_s6, %s217_s6 }
  0x20   : > { %p1377_p3 = scmp.ne.s32.totalorder %s217_s6, %s1376_s12  ;;  %p1385_p11 = scmp.lt.s32.totalorder %s1376_s12, %s1376_s12 }
  0x22   : > { %p1379_p6 = pnand %p1377_p3, %p1341_p8  ;;  %p1386_p12 = por %p1385_p11, %p1384_p10 }
  0x24   : > { %p1380_p9 = pneg %p1379_p6 }
  0x26   : > { %p1387_p13 = pnand %p1386_p12, %p1380_p9 }
  0x28   : > { %1390 = shalt.err (!%p1387_p13)
}
  0x29   : > { %1237 = dma.hbm_to_vmem [thread:$0]  (!%p1627_p7), %s1782_s3, 1024, %s217_s6, [#allocation10], %s1785_s8, %s1785_s8, %s1787_s9  }
  0x2a   : > { %s32_s15 = sadd.s32 1, %s1533_s22  ;;  %s44_s16 = sadd.s32 1, %s1525_s20 }
  0x2b   : > { %p33_p8 = scmp.ge.s32.totalorder %s32_s15, 4  ;;  %p51_p0 = scmp.ne.s32.totalorder %s1525_s20, %s1521_s19 }
  0x2c   : > { %p52_p2 = scmp.eq.s32.totalorder %s1537_s23, 0  ;;  %p1247_p3 = scmp.lt.s32.totalorder %s1537_s23, 4 }
  0x2d   : > { %s1803_s15 = smov (%p33_p8, %s32_s15), 0  ;;  %s233_s17 = sand.u32 1, %s1525_s20  }
  0x2e   : > { %p53_p6 = por %p52_p2, %p51_p0  ;;  %s39_s18 = ssub.s32 %s1533_s22, %s1803_s15 }
  0x2f   : > { %p42_p9 = scmp.eq.s32.totalorder %s39_s18, 0  ;;  %s1035_s27 = sshll.u32 %s233_s17, 6 }
  0x30   : > { %s1085_s28 = sshll.u32 %s1533_s22, 10  ;;  %s1793_s0 = sld [smem:[#allocation17_spill]] }
  0x31   : > { %s1668_s29 = scalar_select %p42_p9, %s1525_s20, %s44_s16  }
  0x32   : > { %s237_s10 = scalar_lea.vmem [#allocation3], %s1035_s27  ;;  %p1675_p7 = pnand %p1247_p3, %p53_p6 }
  0x33   : > { %s246_s11 = sshll.u32 %s237_s10, 4  ;;  %s1682_s18 = scalar_lea.hbm %s1780_s1, %s1085_s28  ;;  %s247_s11 = int_to_ptr.vmem [resolvable:$true] %s246_s11 }
  0x34   : > { %s260_s16 = scalar_lea.vmem [#allocation6], %s1035_s27  ;;  %s234_s9 = scalar_lea.sflag [#allocation4], %s233_s17 }
  0x35   : > { %s267_s8 = sshll.u32 %s260_s16, 4  ;;  %p1393_p10 = pneg %p1675_p7  ;;  %s268_s8 = int_to_ptr.vmem [resolvable:$true] %s267_s8 }
  0x36   : > { %s245_s7 = scalar_lea.hbm %s1793_s0, %s1085_s28  ;;  %s1404_s30 = scalar_lea.vmem %s247_s11, 1024 }
  0x37   : > { %p1405_p11 = scmp.ne.s32.totalorder %s247_s11, %s1404_s30  ;;  %s1543_s6 = smov [#allocation3]  }
  0x38   : > { %s1409_s10 = sshll.u32 %s1543_s6, 4  ;;  %s1410_s10 = int_to_ptr.vmem [resolvable:$false] %s1409_s10 }
  0x39   : > { %p1407_p12 = pnand %p1405_p11, %p1393_p10  ;;  %s1411_s0 = scalar_lea.vmem %s1410_s10, 2048 }
  0x3a   : > { %p1412_p8 = scmp.lt.s32.totalorder %s247_s11, %s1410_s10  ;;  %p1413_p0 = scmp.lt.s32.totalorder %s1411_s0, %s1404_s30 }
  0x3b   : > { %p1408_p13 = pneg %p1407_p12 }
  0x3c   : > { %p1414_p2 = por %p1413_p0, %p1412_p8 }
  0x3e   : > { %p1415_p3 = pnand %p1414_p2, %p1408_p13 }
  0x40   : > { %1418 = shalt.err (!%p1415_p3)
}
  0x41   : > { %s1795_s17 = smov 4   ;;  %s1796_s27 = smov 64  }
  0x42   : > { %1241 = dma.hbm_to_vmem [thread:$0]  (!%p1675_p7), %s245_s7, 1024, %s247_s11, %s234_s9, %s1796_s27, %s1796_s27, %s1795_s17  }
  0x43   : > { %s256_s28 = sand.u32 1, %s1537_s23   ;;  %s1432_s14 = scalar_lea.vmem %s268_s8, 1024 }
  0x44   : > { %s257_s13 = scalar_lea.sflag [#allocation7], %s256_s28  ;;  %p1433_p6 = scmp.ne.s32.totalorder %s268_s8, %s1432_s14 }
  0x45   : > { %s1544_s0 = smov [#allocation6]  }
  0x46   : > { %p1435_p9 = pnand %p1433_p6, %p1393_p10  ;;  %s1437_s16 = sshll.u32 %s1544_s0, 4  ;;  %s1438_s16 = int_to_ptr.vmem [resolvable:$false] %s1437_s16 }
  0x47   : > { %s1439_s30 = scalar_lea.vmem %s1438_s16, 2048  ;;  %p1440_p12 = scmp.lt.s32.totalorder %s268_s8, %s1438_s16 }
  0x48   : > { %p1436_p11 = pneg %p1435_p9  ;;  %p1441_p13 = scmp.lt.s32.totalorder %s1439_s30, %s1432_s14 }
  0x4a   : > { %p1442_p8 = por %p1441_p13, %p1440_p12 }
  0x4c   : > { %p1443_p0 = pnand %p1442_p8, %p1436_p11 }
  0x4e   : > { %1446 = shalt.err (!%p1443_p0)
}
  0x4f   : > { %1244 = dma.hbm_to_vmem [thread:$0]  (!%p1675_p7), %s1682_s18, 1024, %s268_s8, %s257_s13, %s1796_s27, %s1796_s27, %s1795_s17  }
  0x50   : > { %279 = sbr.rel (%p1619_p5) target bundleno = 613 (0x265), region = 40  ;;  %s281_s9 = sand.u32 (!%p1619_p5), 1, %s1521_s19  }
  0x51   : > { %s1042_s7 = sshll.u32 (!%p1619_p5), %s281_s9, 6  ;;  %s282_s11 = scalar_lea.sflag (!%p1619_p5), [#allocation4], %s281_s9 }
  0x52   : > { %s1707_s6 = scalar_lea.vmem (!%p1619_p5), [#allocation3], %s1042_s7 }
  0x55   : > { %1496 = dma.done.wait (%p1615_p4), %s282_s11, 1024  }
  0x56   : > { %1498 = vsyncadd (%p1615_p4), %s282_s11, 4294966272  ;;  %s290_s12 = sand.u32 1, %s1607_s24   ;;  %s1714_s8 = scalar_lea.vmem [#allocation6], %s1042_s7 }
  0x57   : > { %s291_s10 = scalar_lea.sflag [#allocation7], %s290_s12 }
  0x58   : > { %1500 = dma.done.wait (%p1615_p4), %s291_s10, 1024  }
  0x59   : > { %1502 = vsyncadd (%p1615_p4), %s291_s10, 4294966272 }
  0x5a   : > { %1504 = dma.done.wait (%p58_p1), [#allocation7], 1024  }
  0x5b   : > { %1506 = vsyncadd (%p58_p1), [#allocation7], 4294966272 }
  0x5c   : > { %1508 = dma.done.wait (%p58_p1), [#allocation10], 1024  }
  0x5d   : > { %1510 = vsyncadd (%p58_p1), [#allocation10], 4294966272  ;;  %p1046_p5 = scmp.ne.s32.totalorder %s1529_s21, 0 }
  0x5f   : > { %336 = sbr.rel (%p1046_p5) target bundleno = 343 (0x157), region = 60 }
  0x64   : > { %v1307_v0 = vld [vmem:[#allocation9 + $0x38] sm:$0xff]   ;;  %v1308_v1 = vld [vmem:[#allocation9 + $0x30] sm:$0xff]   ;;  %v1309_v2 = vld [vmem:[#allocation9 + $0x28] sm:$0xff]  }
  0x65   : > { %1119 = vmatprep.subr.bf16.mxu0 %v1307_v0  ;;  %1183 = vmatprep.subr.bf16.mxu1 %v1307_v0  ;;  %v1310_v3 = vld [vmem:[#allocation9 + $0x20] sm:$0xff]   ;;  %v1311_v6 = vld [vmem:[#allocation9 + $0x18] sm:$0xff]   ;;  %v1312_v7 = vld [vmem:[#allocation9 + $0x10] sm:$0xff]  }
  0x66   : > { %1120 = vmatpush3.bf16.msra.mxu0 %v1307_v0  ;;  %1191 = vmatpush3.bf16.msra.mxu1 %v1307_v0  ;;  %v1315_v4 = vld [vmem:[#allocation8] sm:$0xff]   ;;  %v1313_v8 = vld [vmem:[#allocation9 + $0x8] sm:$0xff]   ;;  %v1319_v12 = vld [vmem:[#allocation8 + $0x10] sm:$0xff]  }
  0x67   : > { %1121 = vmatprep.subr.bf16.mxu0 %v1308_v1  ;;  %1184 = vmatprep.subr.bf16.mxu1 %v1308_v1  ;;  %v1316_v5 = vld [vmem:[#allocation8 + $0x20] sm:$0xff]   ;;  %v1317_v10 = vld [vmem:[#allocation8 + $0x8] sm:$0xff]   ;;  %v1320_v13 = vld [vmem:[#allocation8 + $0x30] sm:$0xff]  }
  0x68   : > { %1135 = vmatprep.mubr.bf16.mxu0 %v1315_v4  ;;  %1143 = vmatprep.mubr.bf16.mxu1 %v1316_v5  ;;  %v1314_v9 = vld [vmem:[#allocation9] sm:$0xff]   ;;  %v1318_v11 = vld [vmem:[#allocation8 + $0x28] sm:$0xff]   ;;  %v1321_v14 = vld [vmem:[#allocation8 + $0x18] sm:$0xff]  }
  0x69   : > { %v1322_v15 = vld [vmem:[#allocation8 + $0x38] sm:$0xff]   ;;  %v1047_v16 = vld [vmem:[%s1783_s4] ss:$0 sm:$0xff] }
  0x6a   : > { %1122 = vmatpush3.bf16.msra.mxu0 %v1308_v1  ;;  %1192 = vmatpush3.bf16.msra.mxu1 %v1308_v1 }
  0x6b   : > { %1123 = vmatprep.subr.bf16.mxu0 %v1309_v2  ;;  %1185 = vmatprep.subr.bf16.mxu1 %v1309_v2 }
  0x6e   : > { %1124 = vmatpush3.bf16.msra.mxu0 %v1309_v2  ;;  %1193 = vmatpush3.bf16.msra.mxu1 %v1309_v2 }
  0x6f   : > { %1125 = vmatprep.subr.bf16.mxu0 %v1310_v3  ;;  %1186 = vmatprep.subr.bf16.mxu1 %v1310_v3 }
  0x72   : > { %1126 = vmatpush3.bf16.msra.mxu0 %v1310_v3  ;;  %1194 = vmatpush3.bf16.msra.mxu1 %v1310_v3 }
  0x73   : > { %1127 = vmatprep.subr.bf16.mxu0 %v1311_v6  ;;  %1187 = vmatprep.subr.bf16.mxu1 %v1311_v6 }
  0x76   : > { %1128 = vmatpush3.bf16.msra.mxu0 %v1311_v6  ;;  %1195 = vmatpush3.bf16.msra.mxu1 %v1311_v6 }
  0x77   : > { %1129 = vmatprep.subr.bf16.mxu0 %v1312_v7  ;;  %1188 = vmatprep.subr.bf16.mxu1 %v1312_v7 }
  0x7a   : > { %1130 = vmatpush3.bf16.msra.mxu0 %v1312_v7  ;;  %1196 = vmatpush3.bf16.msra.mxu1 %v1312_v7 }
  0x7b   : > { %1131 = vmatprep.subr.bf16.mxu0 %v1313_v8  ;;  %1189 = vmatprep.subr.bf16.mxu1 %v1313_v8 }
  0x7e   : > { %1132 = vmatpush3.bf16.msra.mxu0 %v1313_v8  ;;  %1197 = vmatpush3.bf16.msra.mxu1 %v1313_v8 }
  0x7f   : > { %1133 = vmatprep.subr.bf16.mxu0 %v1314_v9  ;;  %1190 = vmatprep.subr.bf16.mxu1 %v1314_v9 }
  0x82   : > { %1134 = vmatpush3.bf16.msra.mxu0 %v1314_v9  ;;  %1198 = vmatpush3.bf16.msra.mxu1 %v1314_v9 }
  0x85   : > { %1136 = vmatmul.mubr.bf16.vlgmr.msra.gmra.mxu0 %v1317_v10  ;;  %1144 = vmatmul.mubr.bf16.vlgmr.msra.gmra.mxu1 %v1318_v11 }
  0x86   : > { %1139 = vmatprep.mubr.bf16.mxu0 %v1319_v12  ;;  %1147 = vmatprep.mubr.bf16.mxu1 %v1320_v13 }
  0x8d   : > { %1140 = vmatmul.mubr.bf16.gmra.mxu0 %v1321_v14  ;;  %1148 = vmatmul.mubr.bf16.gmra.mxu1 %v1322_v15 }
 0x145   : > { %v1137_v17 = vpop.f32.mrf.mxu0  ;;  %v1145_v18 = vpop.f32.mrf.mxu1 }
 0x146   : > { %v515_v19 = vadd.f32 %v1137_v17, %v1047_v16  ;;  %v547_v20 = vadd.f32 %v1145_v18, %v1047_v16 }
 0x147   : > { %v506_v21 = vpop.f32.mrf.mxu0  ;;  %v538_v22 = vpop.f32.mrf.mxu1 }
 0x148   : > { %571 = vst [vmem:[#allocation2 + $0x58] sm:$0xff] %v515_v19  ;;  %579 = vst [vmem:[#allocation2 + $0x10] sm:$0xff] %v547_v20  ;;  %v507_v23 = vadd.f32 %v1047_v16, %v506_v21  ;;  %v539_v24 = vadd.f32 %v1047_v16, %v538_v22 }
 0x149   : > { %v1138_v25 = vpop.f32.mrf.mxu0  ;;  %v1146_v26 = vpop.f32.mrf.mxu1 }
 0x14a   : > { %569 = vst [vmem:[#allocation2 + $0x30] sm:$0xff] %v507_v23  ;;  %577 = vst [vmem:[#allocation2 + $0x40] sm:$0xff] %v539_v24  ;;  %v518_v27 = vadd.f32 %v1138_v25, %v1047_v16  ;;  %v550_v28 = vadd.f32 %v1146_v26, %v1047_v16 }
 0x14b   : > { %v509_v29 = vpop.f32.mrf.mxu0  ;;  %v541_v30 = vpop.f32.mrf.mxu1 }
 0x14c   : > { %572 = vst [vmem:[#allocation2 + $0x18] sm:$0xff] %v518_v27  ;;  %580 = vst [vmem:[#allocation2 + $0x38] sm:$0xff] %v550_v28  ;;  %v510_v31 = vadd.f32 %v1047_v16, %v509_v29  ;;  %v542_v32 = vadd.f32 %v1047_v16, %v541_v30 }
 0x14d   : > { %v1141_v33 = vpop.f32.mrf.mxu0  ;;  %v1149_v34 = vpop.f32.mrf.mxu1 }
 0x14e   : > { %570 = vst [vmem:[#allocation2] sm:$0xff] %v510_v31  ;;  %578 = vst [vmem:[#allocation2 + $0x20] sm:$0xff] %v542_v32  ;;  %v531_v35 = vadd.f32 %v1141_v33, %v1047_v16  ;;  %v563_v36 = vadd.f32 %v1149_v34, %v1047_v16 }
 0x14f   : > { %v522_v37 = vpop.f32.mrf.mxu0  ;;  %v554_v38 = vpop.f32.mrf.mxu1 }
 0x150   : > { %575 = vst [vmem:[#allocation2 + $0x8] sm:$0xff] %v531_v35  ;;  %583 = vst [vmem:[#allocation2 + $0x78] sm:$0xff] %v563_v36  ;;  %v523_v39 = vadd.f32 %v1047_v16, %v522_v37  ;;  %v555_v40 = vadd.f32 %v1047_v16, %v554_v38 }
 0x151   : > { %v1142_v41 = vpop.f32.mrf.mxu0  ;;  %v1150_v42 = vpop.f32.mrf.mxu1 }
 0x152   : > { %573 = vst [vmem:[#allocation2 + $0x50] sm:$0xff] %v523_v39  ;;  %581 = vst [vmem:[#allocation2 + $0x60] sm:$0xff] %v555_v40  ;;  %v534_v43 = vadd.f32 %v1142_v41, %v1047_v16  ;;  %v566_v44 = vadd.f32 %v1150_v42, %v1047_v16 }
 0x153   : > { %v525_v45 = vpop.f32.mrf.mxu0  ;;  %v557_v46 = vpop.f32.mrf.mxu1 }
 0x154   : > { %576 = vst [vmem:[#allocation2 + $0x48] sm:$0xff] %v534_v43  ;;  %584 = vst [vmem:[#allocation2 + $0x28] sm:$0xff] %v566_v44  ;;  %v526_v47 = vadd.f32 %v1047_v16, %v525_v45  ;;  %v558_v48 = vadd.f32 %v1047_v16, %v557_v46 }
 0x156   : > { %574 = vst [vmem:[#allocation2 + $0x68] sm:$0xff] %v526_v47  ;;  %582 = vst [vmem:[#allocation2 + $0x70] sm:$0xff] %v558_v48 }
 0x157 PF: > { %v1323_v49 = vld [vmem:[%s1714_s8 + $0x38] sm:$0xff]   ;;  %v1324_v50 = vld [vmem:[%s1714_s8 + $0x30] sm:$0xff]   ;;  %v1325_v51 = vld [vmem:[%s1714_s8 + $0x28] sm:$0xff]   ;;  %p1080_p1 = scmp.ne.s32.totalorder %s1529_s21, 3 }
 0x158   : > { %1151 = vmatprep.subr.bf16.mxu0 %v1323_v49  ;;  %1199 = vmatprep.subr.bf16.mxu1 %v1323_v49  ;;  %v1326_v52 = vld [vmem:[%s1714_s8 + $0x20] sm:$0xff]   ;;  %v1327_v55 = vld [vmem:[%s1714_s8 + $0x18] sm:$0xff]   ;;  %v1328_v56 = vld [vmem:[%s1714_s8 + $0x10] sm:$0xff]  }
 0x159   : > { %1152 = vmatpush3.bf16.msra.mxu0 %v1323_v49  ;;  %1207 = vmatpush3.bf16.msra.mxu1 %v1323_v49  ;;  %v1331_v53 = vld [vmem:[%s1707_s6] sm:$0xff]   ;;  %v1329_v57 = vld [vmem:[%s1714_s8 + $0x8] sm:$0xff]   ;;  %v1335_v61 = vld [vmem:[%s1707_s6 + $0x10] sm:$0xff]  }
 0x15a   : > { %1153 = vmatprep.subr.bf16.mxu0 %v1324_v50  ;;  %1200 = vmatprep.subr.bf16.mxu1 %v1324_v50  ;;  %v1332_v54 = vld [vmem:[%s1707_s6 + $0x20] sm:$0xff]   ;;  %v1333_v59 = vld [vmem:[%s1707_s6 + $0x8] sm:$0xff]   ;;  %v1336_v62 = vld [vmem:[%s1707_s6 + $0x30] sm:$0xff]  }
 0x15b   : > { %1167 = vmatprep.mubr.bf16.mxu0 %v1331_v53  ;;  %1175 = vmatprep.mubr.bf16.mxu1 %v1332_v54  ;;  %v1330_v58 = vld [vmem:[%s1714_s8] sm:$0xff]   ;;  %v1334_v60 = vld [vmem:[%s1707_s6 + $0x28] sm:$0xff]   ;;  %v1337_v63 = vld [vmem:[%s1707_s6 + $0x18] sm:$0xff]  }
 0x15c   : > { %v1338_v0 = vld [vmem:[%s1707_s6 + $0x38] sm:$0xff]   ;;  %v595_v2 = vld [vmem:[#allocation2 + $0x10] sm:$0xff]  ;;  %v593_v6 = vld [vmem:[#allocation2 + $0x40] sm:$0xff] }
 0x15d   : > { %1154 = vmatpush3.bf16.msra.mxu0 %v1324_v50  ;;  %1208 = vmatpush3.bf16.msra.mxu1 %v1324_v50  ;;  %v587_v1 = vld [vmem:[#allocation2 + $0x58] sm:$0xff]  ;;  %v585_v5 = vld [vmem:[#allocation2 + $0x30] sm:$0xff]  ;;  %v586_v17 = vld [vmem:[#allocation2] sm:$0xff] }
 0x15e   : > { %1155 = vmatprep.subr.bf16.mxu0 %v1325_v51  ;;  %1201 = vmatprep.subr.bf16.mxu1 %v1325_v51  ;;  %v588_v11 = vld [vmem:[#allocation2 + $0x18] sm:$0xff]  ;;  %v594_v18 = vld [vmem:[#allocation2 + $0x20] sm:$0xff]  ;;  %v591_v23 = vld [vmem:[#allocation2 + $0x8] sm:$0xff] }
 0x15f   : > { %v596_v12 = vld [vmem:[#allocation2 + $0x38] sm:$0xff]  ;;  %v589_v29 = vld [vmem:[#allocation2 + $0x50] sm:$0xff]  ;;  %v597_v30 = vld [vmem:[#allocation2 + $0x60] sm:$0xff] }
 0x160   : > { %v599_v24 = vld [vmem:[#allocation2 + $0x78] sm:$0xff]  ;;  %v592_v35 = vld [vmem:[#allocation2 + $0x48] sm:$0xff]  ;;  %v598_v42 = vld [vmem:[#allocation2 + $0x70] sm:$0xff] }
 0x161   : > { %1156 = vmatpush3.bf16.msra.mxu0 %v1325_v51  ;;  %1209 = vmatpush3.bf16.msra.mxu1 %v1325_v51  ;;  %v600_v36 = vld [vmem:[#allocation2 + $0x28] sm:$0xff] }
 0x162   : > { %1157 = vmatprep.subr.bf16.mxu0 %v1326_v52  ;;  %1202 = vmatprep.subr.bf16.mxu1 %v1326_v52  ;;  %v590_v41 = vld [vmem:[#allocation2 + $0x68] sm:$0xff] }
 0x165   : > { %1158 = vmatpush3.bf16.msra.mxu0 %v1326_v52  ;;  %1210 = vmatpush3.bf16.msra.mxu1 %v1326_v52 }
 0x166   : > { %1159 = vmatprep.subr.bf16.mxu0 %v1327_v55  ;;  %1203 = vmatprep.subr.bf16.mxu1 %v1327_v55 }
 0x169   : > { %1160 = vmatpush3.bf16.msra.mxu0 %v1327_v55  ;;  %1211 = vmatpush3.bf16.msra.mxu1 %v1327_v55 }
 0x16a   : > { %1161 = vmatprep.subr.bf16.mxu0 %v1328_v56  ;;  %1204 = vmatprep.subr.bf16.mxu1 %v1328_v56 }
 0x16d   : > { %1162 = vmatpush3.bf16.msra.mxu0 %v1328_v56  ;;  %1212 = vmatpush3.bf16.msra.mxu1 %v1328_v56 }
 0x16e   : > { %1163 = vmatprep.subr.bf16.mxu0 %v1329_v57  ;;  %1205 = vmatprep.subr.bf16.mxu1 %v1329_v57 }
 0x171   : > { %1164 = vmatpush3.bf16.msra.mxu0 %v1329_v57  ;;  %1213 = vmatpush3.bf16.msra.mxu1 %v1329_v57 }
 0x172   : > { %1165 = vmatprep.subr.bf16.mxu0 %v1330_v58  ;;  %1206 = vmatprep.subr.bf16.mxu1 %v1330_v58 }
 0x175   : > { %1166 = vmatpush3.bf16.msra.mxu0 %v1330_v58  ;;  %1214 = vmatpush3.bf16.msra.mxu1 %v1330_v58 }
 0x178   : > { %1168 = vmatmul.mubr.bf16.vlgmr.msra.gmra.mxu0 %v1333_v59  ;;  %1176 = vmatmul.mubr.bf16.vlgmr.msra.gmra.mxu1 %v1334_v60 }
 0x179   : > { %1171 = vmatprep.mubr.bf16.mxu0 %v1335_v61  ;;  %1179 = vmatprep.mubr.bf16.mxu1 %v1336_v62 }
 0x180   : > { %1172 = vmatmul.mubr.bf16.gmra.mxu0 %v1337_v63  ;;  %1180 = vmatmul.mubr.bf16.gmra.mxu1 %v1338_v0 }
 0x238   : > { %v1169_v3 = vpop.f32.mrf.mxu0  ;;  %v1177_v4 = vpop.f32.mrf.mxu1 }
 0x239   : > { %v828_v7 = vadd.f32 %v1169_v3, %v587_v1  ;;  %v836_v8 = vadd.f32 %v1177_v4, %v595_v2 }
 0x23a   : > { %v763_v9 = vpop.f32.mrf.mxu0  ;;  %v795_v10 = vpop.f32.mrf.mxu1 }
 0x23b   : > { %844 = vst [vmem:[#allocation2 + $0x58] sm:$0xff] %v828_v7  ;;  %852 = vst [vmem:[#allocation2 + $0x10] sm:$0xff] %v836_v8  ;;  %v826_v13 = vadd.f32 %v763_v9, %v585_v5  ;;  %v834_v14 = vadd.f32 %v795_v10, %v593_v6 }
 0x23c   : > { %v1170_v15 = vpop.f32.mrf.mxu0  ;;  %v1178_v16 = vpop.f32.mrf.mxu1 }
 0x23d   : > { %842 = vst [vmem:[#allocation2 + $0x30] sm:$0xff] %v826_v13  ;;  %850 = vst [vmem:[#allocation2 + $0x40] sm:$0xff] %v834_v14  ;;  %v829_v19 = vadd.f32 %v1170_v15, %v588_v11  ;;  %v837_v20 = vadd.f32 %v1178_v16, %v596_v12 }
 0x23e   : > { %v766_v21 = vpop.f32.mrf.mxu0  ;;  %v798_v22 = vpop.f32.mrf.mxu1 }
 0x23f   : > { %845 = vst [vmem:[#allocation2 + $0x18] sm:$0xff] %v829_v19  ;;  %853 = vst [vmem:[#allocation2 + $0x38] sm:$0xff] %v837_v20  ;;  %v827_v25 = vadd.f32 %v766_v21, %v586_v17  ;;  %v835_v26 = vadd.f32 %v798_v22, %v594_v18 }
 0x240   : > { %v1173_v27 = vpop.f32.mrf.mxu0  ;;  %v1181_v28 = vpop.f32.mrf.mxu1 }
 0x241   : > { %843 = vst [vmem:[#allocation2] sm:$0xff] %v827_v25  ;;  %851 = vst [vmem:[#allocation2 + $0x20] sm:$0xff] %v835_v26  ;;  %v832_v31 = vadd.f32 %v1173_v27, %v591_v23  ;;  %v840_v32 = vadd.f32 %v1181_v28, %v599_v24 }
 0x242   : > { %v779_v33 = vpop.f32.mrf.mxu0  ;;  %v811_v34 = vpop.f32.mrf.mxu1 }
 0x243   : > { %848 = vst [vmem:[#allocation2 + $0x8] sm:$0xff] %v832_v31  ;;  %856 = vst [vmem:[#allocation2 + $0x78] sm:$0xff] %v840_v32  ;;  %v830_v37 = vadd.f32 %v779_v33, %v589_v29  ;;  %v838_v38 = vadd.f32 %v811_v34, %v597_v30 }
 0x244   : > { %v1174_v39 = vpop.f32.mrf.mxu0  ;;  %v1182_v40 = vpop.f32.mrf.mxu1 }
 0x245   : > { %846 = vst [vmem:[#allocation2 + $0x50] sm:$0xff] %v830_v37  ;;  %854 = vst [vmem:[#allocation2 + $0x60] sm:$0xff] %v838_v38  ;;  %v833_v43 = vadd.f32 %v1174_v39, %v592_v35  ;;  %v841_v44 = vadd.f32 %v1182_v40, %v600_v36  ;;  %861 = sbr.rel (%p1080_p1) target bundleno = 597 (0x255), region = 64 }
 0x246   : > { %v782_v45 = vpop.f32.mrf.mxu0  ;;  %v814_v46 = vpop.f32.mrf.mxu1 }
 0x247   : > { %849 = vst [vmem:[#allocation2 + $0x48] sm:$0xff] %v833_v43  ;;  %857 = vst [vmem:[#allocation2 + $0x28] sm:$0xff] %v841_v44  ;;  %v831_v47 = vadd.f32 %v782_v45, %v590_v41  ;;  %v839_v48 = vadd.f32 %v814_v46, %v598_v42 }
 0x249   : > { %847 = vst [vmem:[#allocation2 + $0x68] sm:$0xff] %v831_v47  ;;  %855 = vst [vmem:[#allocation2 + $0x70] sm:$0xff] %v839_v48 }
 0x24a   : > { %v862_v49 = vld [vmem:[#allocation2 + $0x30] sm:$0xff]  ;;  %v863_v50 = vld [vmem:[#allocation2] sm:$0xff]  ;;  %v864_v51 = vld [vmem:[#allocation2 + $0x58] sm:$0xff] }
 0x24b   : > { %v878_v52 = vmax.f32 %v862_v49, 0.0  ;;  %v879_v53 = vmax.f32 %v863_v50, 0.0  ;;  %v880_v54 = vmax.f32 %v864_v51, 0.0  ;;  %v865_v55 = vld [vmem:[#allocation2 + $0x18] sm:$0xff]  ;;  %v868_v61 = vld [vmem:[#allocation2 + $0x8] sm:$0xff]  ;;  %v870_v63 = vld [vmem:[#allocation2 + $0x40] sm:$0xff] }
 0x24c   : > { %v866_v56 = vld [vmem:[#allocation2 + $0x50] sm:$0xff]  ;;  %v881_v58 = vmax.f32 %v865_v55, 0.0  ;;  %v884_v0 = vmax.f32 %v868_v61, 0.0  ;;  %v886_v2 = vmax.f32 %v870_v63, 0.0  ;;  %v871_v3 = vld [vmem:[#allocation2 + $0x20] sm:$0xff]  ;;  %v873_v5 = vld [vmem:[#allocation2 + $0x38] sm:$0xff] }
 0x24d   : > { %v882_v59 = vmax.f32 %v866_v56, 0.0  ;;  %894 = vst [vmem:[#allocation11] sm:$0xff] %v878_v52  ;;  %895 = vst [vmem:[#allocation11 + $0x8] sm:$0xff] %v879_v53  ;;  %v872_v4 = vld [vmem:[#allocation2 + $0x10] sm:$0xff]  ;;  %v887_v6 = vmax.f32 %v871_v3, 0.0  ;;  %v889_v8 = vmax.f32 %v873_v5, 0.0 }
 0x24e   : > { %v869_v62 = vld [vmem:[#allocation2 + $0x48] sm:$0xff]  ;;  %896 = vst [vmem:[#allocation11 + $0x10] sm:$0xff] %v880_v54  ;;  %897 = vst [vmem:[#allocation11 + $0x18] sm:$0xff] %v881_v58  ;;  %v888_v7 = vmax.f32 %v872_v4, 0.0  ;;  %v874_v9 = vld [vmem:[#allocation2 + $0x60] sm:$0xff] }
 0x24f   : > { %v885_v1 = vmax.f32 %v869_v62, 0.0  ;;  %898 = vst [vmem:[#allocation11 + $0x20] sm:$0xff] %v882_v59  ;;  %v876_v11 = vld [vmem:[#allocation2 + $0x78] sm:$0xff]  ;;  %900 = vst [vmem:[#allocation11 + $0x30] sm:$0xff] %v884_v0  ;;  %v890_v12 = vmax.f32 %v874_v9, 0.0  ;;  %v877_v15 = vld [vmem:[#allocation2 + $0x28] sm:$0xff] }
 0x250   : > { %v867_v57 = vld [vmem:[#allocation2 + $0x68] sm:$0xff]  ;;  %v875_v10 = vld [vmem:[#allocation2 + $0x70] sm:$0xff]  ;;  %902 = vst [vmem:[#allocation11 + $0x40] sm:$0xff] %v886_v2  ;;  %v892_v14 = vmax.f32 %v876_v11, 0.0  ;;  %903 = vst [vmem:[#allocation11 + $0x48] sm:$0xff] %v887_v6  ;;  %v893_v16 = vmax.f32 %v877_v15, 0.0 }
 0x251   : > { %v883_v60 = vmax.f32 %v867_v57, 0.0  ;;  %901 = vst [vmem:[#allocation11 + $0x38] sm:$0xff] %v885_v1  ;;  %v891_v13 = vmax.f32 %v875_v10, 0.0  ;;  %904 = vst [vmem:[#allocation11 + $0x50] sm:$0xff] %v888_v7 }
 0x252   : > { %905 = vst [vmem:[#allocation11 + $0x58] sm:$0xff] %v889_v8  ;;  %906 = vst [vmem:[#allocation11 + $0x60] sm:$0xff] %v890_v12 }
 0x253   : > { %899 = vst [vmem:[#allocation11 + $0x28] sm:$0xff] %v883_v60  ;;  %907 = vst [vmem:[#allocation11 + $0x68] sm:$0xff] %v891_v13 }
 0x254   : > { %908 = vst [vmem:[#allocation11 + $0x70] sm:$0xff] %v892_v14  ;;  %909 = vst [vmem:[#allocation11 + $0x78] sm:$0xff] %v893_v16 }
 0x255 PF: > { %p1250_p4 = scmp.eq.s32.totalorder %s1607_s24, 3  ;;  %s1545_s21 = smov [#allocation11]  }
 0x256   : > { %s919_s18 = sshll.u32 %s1545_s21, 4  ;;  %s920_s18 = int_to_ptr.vmem [resolvable:$true] %s919_s18 }
 0x257   : > { %s1447_s17 = scalar_lea.vmem %s920_s18, 2048  ;;  %p1454_p3 = scmp.lt.s32.totalorder %s920_s18, %s920_s18 }
 0x258   : > { %p1448_p7 = scmp.ne.s32.totalorder %s920_s18, %s1447_s17  ;;  %p1455_p6 = scmp.lt.s32.totalorder %s1447_s17, %s1447_s17 }
 0x25a   : > { %p1449_p10 = pnand %p1448_p7, %p1250_p4  ;;  %p1456_p9 = por %p1455_p6, %p1454_p3 }
 0x25c   : > { %p1450_p2 = pneg %p1449_p10 }
 0x25e   : > { %p1457_p11 = pnand %p1456_p9, %p1450_p2 }
 0x260   : > { %1460 = shalt.err (!%p1457_p11)
}
 0x261   : > { %s1546_s27 = smov 128   ;;  %s1547_s28 = smov 8  }
 0x262   : > { %1228 = dma.vmem_to_hbm [thread:$0]  (%p1250_p4), %s920_s18, 2048, %s1784_s5, [#allocation5], %s1546_s27, %s1546_s27, %s1547_s28  }
 0x263   : > { %1512 = dma.done.wait (%p1250_p4), [#allocation5], 2048  }
 0x264   : > { %1514 = vsyncadd (%p1250_p4), [#allocation5], 4294965248 }
 0x265 PF: > { %s23_s23 = sadd.s32 1, %s1537_s23   ;;  %s1797_s18 = smov %s1521_s19 }
 0x266   : > { %p20_p12 = scmp.ge.s32.totalorder %s23_s23, 6   ;;  %s1798_s19 = smov %s1525_s20 }
 0x267   : > { %s1799_s20 = smov %s1668_s29  ;;  %s1800_s21 = smov %s1533_s22 }
 0x268   : > { %s1801_s22 = smov %s1803_s15  ;;  %22 = sbr.rel (!%p20_p12) target bundleno = 10 (0xa), region = 108 }
 0x26d   :  { %935 = vsyncpa [#allocation4], 1 }
 0x26e   :  { %937 = vsyncpa [#allocation4 + $0x1], 1 }
 0x26f   :  { %938 = vsyncpa [#allocation7], 1 }
 0x270   :  { %940 = vsyncpa [#allocation7 + $0x1], 1 }
 0x271   :  { %941 = vsyncpa [#allocation10], 1 }
 0x272   :  { %942 = vsyncpa [#allocation5], 1 }
 0x273   :  { %944 = vsyncpa [#allocation5 + $0x1], 1 }

</bundles_post_ra>
